<compile_context>
chip_gen: v7x
topology: tpu7x:2x2x1
jax: 0.10.0
libtpu: 0.0.40
codegen_flags: <defaults>
</compile_context>

<pallas_src>
import jax
import jax.numpy as jnp
from jax.experimental import pallas as pl
from jax.experimental.pallas import tpu as pltpu


# --------------------------------------------------------------------------
# helpers
# --------------------------------------------------------------------------
def _round_up(n, m):
    return ((n + m - 1) // m) * m


def _pad_tile_bytes(rows, cols, itemsize=4):
    """Bytes a [rows, cols] f32 block really occupies in VMEM ((8,128) tiles)."""
    return _round_up(max(rows, 1), 8) * _round_up(max(cols, 1), 128) * itemsize


def _block_diag_repeat(w, f):
    """[r, c] -> [f*r, f*c] block-diagonal with f copies of w (tiny weights)."""
    if f == 1:
        return w
    r, c = w.shape
    eye = jnp.eye(f, dtype=w.dtype)
    return (eye[:, None, :, None] * w[None, :, None, :]).reshape(f * r, f * c)


def _pick_fold(batch, in_dim, hid, out_dim, max_fold=8, weight_budget=8 << 20):
    """Largest power-of-2 fold factor that divides B and keeps the
    block-diagonal weights (which grow ~F^2) comfortably small."""
    f = 1
    while (2 * f <= max_fold
           and batch % (2 * f) == 0
           and 4 * (2 * f) ** 2 * (in_dim * hid + hid * out_dim) <= weight_budget):
        f *= 2
    return f


def _vmem_budget_bytes():
    """~75% of this generation's VMEM (48 MiB on v7x, ~96 MiB on v5e/v6e)."""
    cap = 64 << 20  # conservative fallback (v7x-sized) if the query fails
    try:
        info = pltpu.get_tpu_info()
        cap = int(getattr(info, "vmem_capacity_bytes", 0)) or cap
    except Exception:
        pass
    return min(int(cap * 0.75), 100 << 20)


# --------------------------------------------------------------------------
# kernel
# --------------------------------------------------------------------------
def _make_var_forward_kernel(num_inputs, folded_widths):
    """Kernel closure over the (static) folded input widths."""

    def kernel(*refs):
        xs = refs[:num_inputs]                                # each [TBf, F*d_i]
        w1_ref, b1_ref, w2_ref, b2_ref = refs[num_inputs:num_inputs + 4]
        o_ref = refs[num_inputs + 4]

        if num_inputs > 1:
            # Copy the already-resident input tiles into one VMEM scratch and
            # issue a single first-layer matmul (one MXU push instead of a
            # serial chain of small-K dots).
            xcat_ref = refs[num_inputs + 5]
            off = 0
            for i, d in enumerate(folded_widths):
                xcat_ref[:, off:off + d] = xs[i][...]
                off += d
            x = xcat_ref[...]
        else:
            x = xs[0][...]

        # h = tanh(x_folded @ W1_blockdiag + b1_tiled)
        h = jnp.dot(x, w1_ref[...], preferred_element_type=jnp.float32)
        h = jnp.tanh(h + b1_ref[...])                          # [TBf, F*hid]

        # v = h @ W2_blockdiag + b2_tiled
        v = jnp.dot(h, w2_ref[...], preferred_element_type=jnp.float32)
        v = v + b2_ref[...]                                    # [TBf, F*out]

        # softplus(v), numerically stable; lane-dense store (F*out >= 128).
        o_ref[...] = jnp.maximum(v, 0.0) + jnp.log1p(jnp.exp(-jnp.abs(v)))

    return kernel


# --------------------------------------------------------------------------
# wrapper
# --------------------------------------------------------------------------
def var_forward(inp_list, w1, b1, w2, b2, *, max_fold=8, max_batch_rows=32768):
    """inp_list: list of [B, d_i] f32 arrays (concatenated along features).

    w1: [in_dim, 2*out_dim], b1: [2*out_dim], w2: [2*out_dim, out_dim],
    b2: [out_dim]  (weights stored [in, out], i.e. transposed vs. nn.Linear).
    """
    widths = [int(a.shape[1]) for a in inp_list]
    B = int(inp_list[0].shape[0])
    in_dim = sum(widths)
    hid = int(w1.shape[1])            # 2 * out_dim
    out_dim = int(w2.shape[1])
    n_in = len(inp_list)

    # ---- lane-dense batch fold -------------------------------------------
    F = _pick_fold(B, in_dim, hid, out_dim, max_fold)
    Bf = B // F
    widths_f = [F * d for d in widths]
    in_f, hid_f, out_f = F * in_dim, F * hid, F * out_dim

    # Free row-major reshapes; no HBM concat of the activations anywhere.
    xs_f = [a.reshape(Bf, F * d) for a, d in zip(inp_list, widths)]

    # Combined block-diagonal first-layer weight: row blocks follow the
    # folded-concat order [x0_fold | x1_fold | ...].
    w1_parts, off = [], 0
    for d in widths:
        w1_parts.append(_block_diag_repeat(w1[off:off + d, :], F))
        off += d
    w1_bd = jnp.concatenate(w1_parts, axis=0) if n_in > 1 else w1_parts[0]
    w2_bd = _block_diag_repeat(w2, F)
    b1_t = jnp.tile(b1, F).reshape(1, hid_f)
    b2_t = jnp.tile(b2, F).reshape(1, out_f)

    # ---- batch tile from *padded* VMEM footprint ---------------------------
    fixed_bytes = 2 * (_pad_tile_bytes(in_f, hid_f) + _pad_tile_bytes(1, hid_f)
                       + _pad_tile_bytes(hid_f, out_f) + _pad_tile_bytes(1, out_f))

    def per_tile_bytes(tbf):
        n = 2 * sum(_pad_tile_bytes(tbf, wf) for wf in widths_f)   # inputs x2 buf
        n += 2 * _pad_tile_bytes(tbf, out_f)                        # output x2 buf
        if n_in > 1:
            n += _pad_tile_bytes(tbf, in_f)                         # concat scratch
        n += _pad_tile_bytes(tbf, hid_f) + _pad_tile_bytes(tbf, out_f)  # h, v temps
        return n

    budget = _vmem_budget_bytes()
    cap_f = max(8, max_batch_rows // F)
    TBf = min(Bf, cap_f)
    if TBf < Bf:
        TBf = max(8, (TBf // 8) * 8)
    while TBf > 8 and fixed_bytes + int(1.3 * per_tile_bytes(TBf)) > budget:
        TBf = max(8, (TBf // 2 // 8) * 8)

    vmem_limit = fixed_bytes + int(1.5 * per_tile_bytes(TBf))
    vmem_limit = min(budget, max(vmem_limit, 16 * 1024 * 1024))

    grid = (pl.cdiv(Bf, TBf),)

    # ---- specs --------------------------------------------------------------
    x_specs = [pl.BlockSpec((TBf, wf), lambda i: (i, 0)) for wf in widths_f]
    w_specs = [
        pl.BlockSpec((in_f, hid_f), lambda i: (0, 0)),    # W1 (block-diag)
        pl.BlockSpec((1, hid_f), lambda i: (0, 0)),       # b1 (tiled)
        pl.BlockSpec((hid_f, out_f), lambda i: (0, 0)),   # W2 (block-diag)
        pl.BlockSpec((1, out_f), lambda i: (0, 0)),       # b2 (tiled)
    ]
    out_spec = pl.BlockSpec((TBf, out_f), lambda i: (i, 0))
    scratch = [pltpu.VMEM((TBf, in_f), jnp.float32)] if n_in > 1 else []

    cost = pl.CostEstimate(
        flops=2 * B * F * (in_dim * hid + hid * out_dim),
        transcendentals=B * (hid + 2 * out_dim),            # tanh + exp + log1p
        bytes_accessed=4 * (B * (in_dim + out_dim)
                            + F * F * (in_dim * hid + hid * out_dim)
                            + F * (hid + out_dim)),
    )

    out_folded = pl.pallas_call(
        _make_var_forward_kernel(n_in, tuple(widths_f)),
        out_shape=jax.ShapeDtypeStruct((Bf, out_f), jnp.float32),
        grid=grid,
        in_specs=x_specs + w_specs,
        out_specs=out_spec,
        scratch_shapes=scratch,
        compiler_params=pltpu.CompilerParams(
            dimension_semantics=("parallel",),   # sharded across TCs on v7x
            vmem_limit_bytes=vmem_limit,
        ),
        cost_estimate=cost,
    )(*xs_f, w1_bd, b1_t, w2_bd, b2_t)

    # Free row-major un-fold back to [B, out_dim].
    return out_folded.reshape(B, out_dim)


# --------------------------------------------------------------------------
# reference / init
# --------------------------------------------------------------------------
def init_params(key, in_dim, out_dim):
    """Deterministic init mimicking nn.Linear's U(-1/sqrt(fan_in), 1/sqrt(fan_in))."""
    hid = out_dim * 2
    k1, k2, k3, k4 = jax.random.split(key, 4)
    bound1 = 1.0 / jnp.sqrt(in_dim)
    bound2 = 1.0 / jnp.sqrt(hid)
    w1 = jax.random.uniform(k1, (in_dim, hid), jnp.float32, -bound1, bound1)
    b1 = jax.random.uniform(k2, (hid,), jnp.float32, -bound1, bound1)
    w2 = jax.random.uniform(k3, (hid, out_dim), jnp.float32, -bound2, bound2)
    b2 = jax.random.uniform(k4, (out_dim,), jnp.float32, -bound2, bound2)
    return w1, b1, w2, b2


def reference(inp_list, w1, b1, w2, b2):
    x = jnp.concatenate(inp_list, axis=1)
    h = jnp.tanh(x @ w1 + b1)
    v = h @ w2 + b2
    return jax.nn.softplus(v)


if __name__ == "__main__":
    key = jax.random.PRNGKey(0)
    k_in1, k_in2, k_p = jax.random.split(key, 3)

    batch = 16          # small, but divisible by 8 so the lane-dense fold kicks in
    out_dim = 32
    # two input tensors of width 16 each -> in_dim = 32 after (virtual) concat
    inp = [
        jax.random.normal(k_in1, (batch, 16), jnp.float32),
        jax.random.normal(k_in2, (batch, 16), jnp.float32),
    ]
    in_dim = sum(a.shape[1] for a in inp)

    w1, b1, w2, b2 = init_params(k_p, in_dim, out_dim)

    out = var_forward(inp, w1, b1, w2, b2)
    out = jax.block_until_ready(out)

    ref = reference(inp, w1, b1, w2, b2)
    assert out.shape == (batch, out_dim)
    assert jnp.allclose(out, ref, atol=1e-5, rtol=1e-5), "mismatch vs reference"

    print("KERNEL_OK")
</pallas_src>

<mosaic_0001>
module attributes {stable_mosaic.version = 11 : i64} {
  func.func @kernel(%arg0: i32, %arg1: memref<2x128xf32, #tpu.memory_space<vmem>>, %arg2: memref<2x128xf32, #tpu.memory_space<vmem>>, %arg3: memref<256x512xf32, #tpu.memory_space<vmem>>, %arg4: memref<1x512xf32, #tpu.memory_space<vmem>>, %arg5: memref<512x256xf32, #tpu.memory_space<vmem>>, %arg6: memref<1x256xf32, #tpu.memory_space<vmem>>, %arg7: memref<2x256xf32, #tpu.memory_space<vmem>>, %arg8: memref<2x256xf32, #tpu.memory_space<vmem>>) attributes {dimension_semantics = [#tpu.dimension_semantics<parallel>], iteration_bounds = array<i64: 1>, scalar_prefetch = 0 : i64, scratch_operands = 1 : i64, tpu.core_type = #tpu.core_type<tc>, window_params = [{transform_indices = @transform_0, window_bounds = array<i64: 2, 128>}, {transform_indices = @transform_1, window_bounds = array<i64: 2, 128>}, {pipeline_mode = #tpu.pipeline_mode<synchronous>, transform_indices = @transform_2, window_bounds = array<i64: 256, 512>}, {pipeline_mode = #tpu.pipeline_mode<synchronous>, transform_indices = @transform_3, window_bounds = array<i64: 1, 512>}, {pipeline_mode = #tpu.pipeline_mode<synchronous>, transform_indices = @transform_4, window_bounds = array<i64: 512, 256>}, {pipeline_mode = #tpu.pipeline_mode<synchronous>, transform_indices = @transform_5, window_bounds = array<i64: 1, 256>}, {transform_indices = @transform_6, window_bounds = array<i64: 2, 256>}]} {
    %c0 = arith.constant 0 : index
    %c0_0 = arith.constant 0 : index
    %0 = vector.load %arg1[%c0, %c0_0] : memref<2x128xf32, #tpu.memory_space<vmem>>, vector<2x128xf32>
    %c0_1 = arith.constant 0 : index
    %c0_2 = arith.constant 0 : index
    %1 = vector.load %arg8[%c0_1, %c0_2] : memref<2x256xf32, #tpu.memory_space<vmem>>, vector<2x128xf32>
    tpu.vector_store %arg8[%c0_1, %c0_2], %0 {strides = array<i32>} : memref<2x256xf32, #tpu.memory_space<vmem>>, vector<2x128xf32>,
    %c0_3 = arith.constant 0 : index
    %c0_4 = arith.constant 0 : index
    %2 = vector.load %arg2[%c0_3, %c0_4] : memref<2x128xf32, #tpu.memory_space<vmem>>, vector<2x128xf32>
    %c0_5 = arith.constant 0 : index
    %c128 = arith.constant 128 : index
    %3 = vector.load %arg8[%c0_5, %c128] : memref<2x256xf32, #tpu.memory_space<vmem>>, vector<2x128xf32>
    tpu.vector_store %arg8[%c0_5, %c128], %2 {strides = array<i32>} : memref<2x256xf32, #tpu.memory_space<vmem>>, vector<2x128xf32>,
    %c0_6 = arith.constant 0 : index
    %c0_7 = arith.constant 0 : index
    %4 = vector.load %arg8[%c0_6, %c0_7] : memref<2x256xf32, #tpu.memory_space<vmem>>, vector<2x256xf32>
    %c0_8 = arith.constant 0 : index
    %c0_9 = arith.constant 0 : index
    %5 = vector.load %arg3[%c0_8, %c0_9] : memref<256x512xf32, #tpu.memory_space<vmem>>, vector<256x512xf32>
    %cst = arith.constant dense<0.000000e+00> : vector<2x512xf32>
    %6 = tpu.matmul %4, %5, %cst {dimension_numbers = #tpu.dot_dimension_numbers<[1], [0], [0], [1], [0, 0, 1, 1], [], []>} : vector<2x256xf32>, vector<256x512xf32>, vector<2x512xf32> -> vector<2x512xf32>
    %c0_10 = arith.constant 0 : index
    %c0_11 = arith.constant 0 : index
    %7 = vector.load %arg4[%c0_10, %c0_11] : memref<1x512xf32, #tpu.memory_space<vmem>>, vector<1x512xf32>
    %8 = vector.broadcast %7 : vector<1x512xf32> to vector<2x512xf32>
    %9 = arith.addf %6, %8 : vector<2x512xf32>
    %10 = math.tanh %9 : vector<2x512xf32>
    %c0_12 = arith.constant 0 : index
    %c0_13 = arith.constant 0 : index
    %11 = vector.load %arg5[%c0_12, %c0_13] : memref<512x256xf32, #tpu.memory_space<vmem>>, vector<512x256xf32>
    %cst_14 = arith.constant dense<0.000000e+00> : vector<2x256xf32>
    %12 = tpu.matmul %10, %11, %cst_14 {dimension_numbers = #tpu.dot_dimension_numbers<[1], [0], [0], [1], [0, 0, 1, 1], [], []>} : vector<2x512xf32>, vector<512x256xf32>, vector<2x256xf32> -> vector<2x256xf32>
    %c0_15 = arith.constant 0 : index
    %c0_16 = arith.constant 0 : index
    %13 = vector.load %arg6[%c0_15, %c0_16] : memref<1x256xf32, #tpu.memory_space<vmem>>, vector<1x256xf32>
    %14 = vector.broadcast %13 : vector<1x256xf32> to vector<2x256xf32>
    %15 = arith.addf %12, %14 : vector<2x256xf32>
    %cst_17 = arith.constant 0.000000e+00 : f32
    %16 = vector.broadcast %cst_17 : f32 to vector<2x256xf32>
    %17 = arith.maximumf %15, %16 : vector<2x256xf32>
    %18 = math.absf %15 : vector<2x256xf32>
    %cst_18 = arith.constant 0.000000e+00 : f32
    %19 = vector.broadcast %cst_18 : f32 to vector<2x256xf32>
    %20 = arith.subf %19, %18 : vector<2x256xf32>
    %21 = math.exp %20 : vector<2x256xf32>
    %22 = math.log1p %21 : vector<2x256xf32>
    %23 = arith.addf %17, %22 : vector<2x256xf32>
    %c0_19 = arith.constant 0 : index
    %c0_20 = arith.constant 0 : index
    %24 = vector.load %arg7[%c0_19, %c0_20] : memref<2x256xf32, #tpu.memory_space<vmem>>, vector<2x256xf32>
    tpu.vector_store %arg7[%c0_19, %c0_20], %23 {strides = array<i32>} : memref<2x256xf32, #tpu.memory_space<vmem>>, vector<2x256xf32>,
    return
  }
  func.func @transform_0(%arg0: i32) -> (i32, i32) {
    %c0_i32 = arith.constant 0 : i32
    %c0_i32_0 = arith.constant 0 : i32
    return %arg0, %c0_i32 : i32, i32
  }
  func.func @transform_1(%arg0: i32) -> (i32, i32) {
    %c0_i32 = arith.constant 0 : i32
    %c0_i32_0 = arith.constant 0 : i32
    return %arg0, %c0_i32 : i32, i32
  }
  func.func @transform_2(%arg0: i32) -> (i32, i32) {
    %c0_i32 = arith.constant 0 : i32
    %c0_i32_0 = arith.constant 0 : i32
    %c0_i32_1 = arith.constant 0 : i32
    return %c0_i32, %c0_i32_0 : i32, i32
  }
  func.func @transform_3(%arg0: i32) -> (i32, i32) {
    %c0_i32 = arith.constant 0 : i32
    %c0_i32_0 = arith.constant 0 : i32
    %c0_i32_1 = arith.constant 0 : i32
    return %c0_i32, %c0_i32_0 : i32, i32
  }
  func.func @transform_4(%arg0: i32) -> (i32, i32) {
    %c0_i32 = arith.constant 0 : i32
    %c0_i32_0 = arith.constant 0 : i32
    %c0_i32_1 = arith.constant 0 : i32
    return %c0_i32, %c0_i32_0 : i32, i32
  }
  func.func @transform_5(%arg0: i32) -> (i32, i32) {
    %c0_i32 = arith.constant 0 : i32
    %c0_i32_0 = arith.constant 0 : i32
    %c0_i32_1 = arith.constant 0 : i32
    return %c0_i32, %c0_i32_0 : i32, i32
  }
  func.func @transform_6(%arg0: i32) -> (i32, i32) {
    %c0_i32 = arith.constant 0 : i32
    %c0_i32_0 = arith.constant 0 : i32
    return %arg0, %c0_i32 : i32, i32
  }
}

</mosaic_0001>

<bundles_post_ra>
// kernel: tpu_custom_call.1
= control target key start
LH: loop header
LB: loop body
LE: loop exit
PB: predicated region body
PF: predicated region fallthrough
CT: control target
= control target key end

     0   :  { %11 = vsyncpa [#allocation4], 0  ;;  %s1225_s0 = inlined_call_operand.hbm [shape: f32[2,128], index: 0, kind: input, shape index: {}]   ;;  %s1226_s1 = inlined_call_operand.vmem [shape: f32[2,128], index: 1, kind: input, shape index: {}]   ;;  %s1227_s2 = inlined_call_operand.hbm [shape: f32[256,512], index: 2, kind: input, shape index: {}]   ;;  %s1228_s3 = inlined_call_operand.vmem [shape: f32[1,512], index: 3, kind: input, shape index: {}]   ;;  %s1229_s4 = inlined_call_operand.hbm [shape: f32[512,256], index: 4, kind: input, shape index: {}]   ;;  %s1230_s5 = inlined_call_operand.vmem [shape: f32[1,256], index: 5, kind: input, shape index: {}]   ;;  %s1231_s6 = inlined_call_operand.hbm [shape: f32[2,256], index: 6, kind: output, shape index: {}]  }
   0x1   :  { %12 = vsyncpa [#allocation7], 0 }
   0x2   :  { %13 = vsyncpa [#allocation5], 0  ;;  %s1095_s21 = smov [#allocation6]   ;;  %s1001_s25 = scalar_lea.hbm %s1227_s2, 16384 }
   0x3   :  { %s31_s22 = sshll.u32 %s1095_s21, 4  ;;  %p1002_p0 = scmp.ne.s32.totalorder %s1227_s2, %s1001_s25  ;;  %s32_s22 = int_to_ptr.vmem [resolvable:$true] %s31_s22 }
   0x4   :  { %p1005_p1 = scmp.lt.u32.totalorder %s1001_s25, %s1227_s2 }
   0x6   :  { %p1007_p2 = pnand %p1005_p1, %p1002_p0 }
   0x8   :  { %1010 = shalt.err (!%p1007_p2)
}
   0x9   :  { %s1011_s30 = scalar_lea.vmem %s32_s22, 16384  ;;  %p1016_p4 = scmp.lt.s32.totalorder %s32_s22, %s32_s22 }
   0xa   :  { %p1012_p3 = scmp.ne.s32.totalorder %s32_s22, %s1011_s30  ;;  %p1017_p5 = scmp.lt.s32.totalorder %s1011_s30, %s1011_s30 }
   0xc   :  { %p1018_p6 = por %p1017_p5, %p1016_p4 }
   0xe   :  { %p1019_p7 = pnand %p1018_p6, %p1012_p3 }
  0x10   :  { %1022 = shalt.err (!%p1019_p7)
}
  0x11   :  { %s1096_s7 = smov 512   ;;  %s1097_s8 = smov 32  }
  0x12   :  { %37 = dma.hbm_to_vmem [thread:$0]  %s1227_s2, 16384, %s32_s22, [#allocation7], %s1096_s7, %s1096_s7, %s1097_s8  }
  0x13   :  { %s1098_s11 = smov [#allocation3]   ;;  %s1099_s13 = smov [#allocation8]  }
  0x14   :  { %s20_s12 = sshll.u32 %s1098_s11, 4  ;;  %s45_s14 = sshll.u32 %s1099_s13, 4  ;;  %s21_s12 = int_to_ptr.vmem [resolvable:$true] %s20_s12  ;;  %s46_s14 = int_to_ptr.vmem [resolvable:$true] %s45_s14 }
  0x15   :  { %s1023_s17 = scalar_lea.hbm %s1225_s0, 32 }
  0x16   :  { %p1024_p8 = scmp.ne.s32.totalorder %s1225_s0, %s1023_s17  ;;  %p1027_p9 = scmp.lt.u32.totalorder %s1023_s17, %s1225_s0 }
  0x18   :  { %p1029_p10 = pnand %p1027_p9, %p1024_p8 }
  0x1a   :  { %1032 = shalt.err (!%p1029_p10)
}
  0x1b   :  { %s1033_s2 = scalar_lea.vmem %s21_s12, 32  ;;  %p1038_p12 = scmp.lt.s32.totalorder %s21_s12, %s21_s12 }
  0x1c   :  { %p1034_p11 = scmp.ne.s32.totalorder %s21_s12, %s1033_s2  ;;  %p1039_p13 = scmp.lt.s32.totalorder %s1033_s2, %s1033_s2 }
  0x1e   :  { %p1040_p0 = por %p1039_p13, %p1038_p12 }
  0x20   :  { %p1041_p1 = pnand %p1040_p0, %p1034_p11 }
  0x22   :  { %1044 = shalt.err (!%p1041_p1)
}
  0x23   :  { %23 = dma.hbm_to_vmem [thread:$0]  %s1225_s0, 32, %s21_s12, [#allocation4]  }
  0x24   :  { %s1045_s26 = scalar_lea.hbm %s1229_s4, 16384 }
  0x25   :  { %p1046_p2 = scmp.ne.s32.totalorder %s1229_s4, %s1045_s26  ;;  %p1049_p3 = scmp.lt.u32.totalorder %s1045_s26, %s1229_s4 }
  0x27   :  { %p1051_p4 = pnand %p1049_p3, %p1046_p2 }
  0x29   :  { %1054 = shalt.err (!%p1051_p4)
}
  0x2a   :  { %s1055_s7 = scalar_lea.vmem %s46_s14, 16384  ;;  %p1060_p6 = scmp.lt.s32.totalorder %s46_s14, %s46_s14 }
  0x2b   :  { %p1056_p5 = scmp.ne.s32.totalorder %s46_s14, %s1055_s7  ;;  %p1061_p7 = scmp.lt.s32.totalorder %s1055_s7, %s1055_s7 }
  0x2d   :  { %p1062_p8 = por %p1061_p7, %p1060_p6 }
  0x2f   :  { %p1063_p9 = pnand %p1062_p8, %p1056_p5 }
  0x31   :  { %1066 = shalt.err (!%p1063_p9)
}
  0x32   :  { %s1100_s0 = smov 256   ;;  %s1101_s8 = smov 16  }
  0x33   :  { %51 = dma.hbm_to_vmem [thread:$0]  %s1229_s4, 16384, %s46_s14, [#allocation7], %s1100_s0, %s1100_s0, %s1101_s8  }
  0x34   :  { %1089 = dma.done.wait [#allocation4], 32  }
  0x35   :  { %1090 = vsyncadd [#allocation4], 4294967264 }
  0x36   :  { %1091 = dma.done.wait [#allocation7], 32768  }
  0x37   :  { %1092 = vsyncadd [#allocation7], 4294934528  ;;  %v69_v0 = vld [vmem:[#allocation6 + $0x8] sm:$0xff]  ;;  %v68_v2 = vld [vmem:[#allocation6] sm:$0xff] }
  0x38   :  { %v73_v1 = vld [vmem:[#allocation6 + $0x28] sm:$0xff]  ;;  %v72_v4 = vld [vmem:[#allocation6 + $0x20] sm:$0xff]  ;;  %v63_v41 = vld [vmem:[#allocation3] sm:$0x3] }
  0x39   :  { %v717_v3 = vpack.c.bf16 %v73_v1, %v69_v0  ;;  %v77_v5 = vld [vmem:[#allocation6 + $0x48] sm:$0xff]  ;;  %v719_v7 = vpack.c.bf16 %v72_v4, %v68_v2  ;;  %v76_v9 = vld [vmem:[#allocation6 + $0x40] sm:$0xff]  ;;  %v65_v42 = vld [vmem:[%s1226_s1] sm:$0x3]  ;;  %64 = vst [vmem:[#allocation2] sm:$0x3] %v63_v41 }
  0x3a   :  { %v81_v6 = vld [vmem:[#allocation6 + $0x68] sm:$0xff]  ;;  %v80_v10 = vld [vmem:[#allocation6 + $0x60] sm:$0xff]  ;;  %66 = vst [vmem:[#allocation2 + $0x2] sm:$0x3] %v65_v42 }
  0x3b   :  { %v721_v8 = vpack.c.bf16 %v81_v6, %v77_v5  ;;  %v85_v11 = vld [vmem:[#allocation6 + $0x88] sm:$0xff]  ;;  %718 = vmatprep.subr.bf16.mxu1 %v717_v3  ;;  %v723_v13 = vpack.c.bf16 %v80_v10, %v76_v9  ;;  %v84_v15 = vld [vmem:[#allocation6 + $0x80] sm:$0xff] }
  0x3c   :  { %v89_v12 = vld [vmem:[#allocation6 + $0xa8] sm:$0xff]  ;;  %720 = vmatpush1.bf16.msra.mxu1 %v719_v7  ;;  %v88_v16 = vld [vmem:[#allocation6 + $0xa0] sm:$0xff] }
  0x3d   :  { %722 = vmatprep.subr.bf16.mxu1 %v721_v8  ;;  %v725_v14 = vpack.c.bf16 %v89_v12, %v85_v11  ;;  %v93_v17 = vld [vmem:[#allocation6 + $0xc8] sm:$0xff]  ;;  %v727_v19 = vpack.c.bf16 %v88_v16, %v84_v15  ;;  %v92_v21 = vld [vmem:[#allocation6 + $0xc0] sm:$0xff] }
  0x3e   :  { %v97_v18 = vld [vmem:[#allocation6 + $0xe8] sm:$0xff]  ;;  %v96_v22 = vld [vmem:[#allocation6 + $0xe0] sm:$0xff] }
  0x3f   :  { %v729_v20 = vpack.c.bf16 %v97_v18, %v93_v17  ;;  %v101_v23 = vld [vmem:[#allocation6 + $0x108] sm:$0xff]  ;;  %v731_v25 = vpack.c.bf16 %v96_v22, %v92_v21  ;;  %v100_v27 = vld [vmem:[#allocation6 + $0x100] sm:$0xff]  ;;  %v377_v21 = vld [vmem:[#allocation8 + $0x10] sm:$0xff] }
  0x40   :  { %724 = vmatpush1.bf16.msra.mxu1 %v723_v13  ;;  %v105_v24 = vld [vmem:[#allocation6 + $0x128] sm:$0xff]  ;;  %v104_v28 = vld [vmem:[#allocation6 + $0x120] sm:$0xff] }
  0x41   :  { %726 = vmatprep.subr.bf16.mxu1 %v725_v14  ;;  %v733_v26 = vpack.c.bf16 %v105_v24, %v101_v23  ;;  %v109_v29 = vld [vmem:[#allocation6 + $0x148] sm:$0xff]  ;;  %v735_v31 = vpack.c.bf16 %v104_v28, %v100_v27  ;;  %v108_v33 = vld [vmem:[#allocation6 + $0x140] sm:$0xff]  ;;  %v1177_v55 = vld.sshfl [vmem:[#allocation2] sm:$0x33 pattern:$0x76325410] }
  0x42   :  { %v113_v30 = vld [vmem:[#allocation6 + $0x168] sm:$0xff]  ;;  %v112_v34 = vld [vmem:[#allocation6 + $0x160] sm:$0xff]  ;;  %v1181_v58 = vcombine.high %v1177_v55, %v1177_v55 }
  0x43   :  { %v737_v32 = vpack.c.bf16 %v113_v30, %v109_v29  ;;  %v117_v35 = vld [vmem:[#allocation6 + $0x188] sm:$0xff]  ;;  %v739_v37 = vpack.c.bf16 %v112_v34, %v108_v33  ;;  %v116_v38 = vld [vmem:[#allocation6 + $0x180] sm:$0xff]  ;;  %v381_v29 = vld [vmem:[#allocation8 + $0x30] sm:$0xff] }
  0x44   :  { %728 = vmatpush1.bf16.msra.mxu1 %v727_v19  ;;  %v121_v36 = vld [vmem:[#allocation6 + $0x1a8] sm:$0xff]  ;;  %v120_v40 = vld [vmem:[#allocation6 + $0x1a0] sm:$0xff]  ;;  %293 = vmatprep.mubr.f32.mxu1 %v1181_v58  ;;  %v378_v19 = vld [vmem:[#allocation8 + $0x18] sm:$0xff] }
  0x45   :  { %730 = vmatprep.subr.bf16.mxu1 %v729_v20  ;;  %v741_v39 = vpack.c.bf16 %v121_v36, %v117_v35  ;;  %v125_v43 = vld [vmem:[#allocation6 + $0x1c8] sm:$0xff]  ;;  %v743_v45 = vpack.c.bf16 %v120_v40, %v116_v38  ;;  %v124_v47 = vld [vmem:[#allocation6 + $0x1c0] sm:$0xff]  ;;  %v385_v40 = vld [vmem:[#allocation8 + $0x50] sm:$0xff] }
  0x46   :  { %v129_v44 = vld [vmem:[#allocation6 + $0x1e8] sm:$0xff]  ;;  %v128_v48 = vld [vmem:[#allocation6 + $0x1e0] sm:$0xff] }
  0x47   :  { %v745_v46 = vpack.c.bf16 %v129_v44, %v125_v43  ;;  %v133_v49 = vld [vmem:[#allocation6 + $0x208] sm:$0xff]  ;;  %v747_v51 = vpack.c.bf16 %v128_v48, %v124_v47  ;;  %v132_v53 = vld [vmem:[#allocation6 + $0x200] sm:$0xff]  ;;  %v390_v43 = vld [vmem:[#allocation8 + $0x78] sm:$0xff] }
  0x48   :  { %732 = vmatpush1.bf16.msra.mxu1 %v731_v25  ;;  %v137_v50 = vld [vmem:[#allocation6 + $0x228] sm:$0xff]  ;;  %v136_v54 = vld [vmem:[#allocation6 + $0x220] sm:$0xff] }
  0x49   :  { %734 = vmatprep.subr.bf16.mxu1 %v733_v26  ;;  %v749_v52 = vpack.c.bf16 %v137_v50, %v133_v49  ;;  %v141_v56 = vld [vmem:[#allocation6 + $0x248] sm:$0xff]  ;;  %v751_v59 = vpack.c.bf16 %v136_v54, %v132_v53  ;;  %v140_v61 = vld [vmem:[#allocation6 + $0x240] sm:$0xff]  ;;  %v382_v26 = vld [vmem:[#allocation8 + $0x38] sm:$0xff] }
  0x4a   :  { %v145_v57 = vld [vmem:[#allocation6 + $0x268] sm:$0xff]  ;;  %v144_v62 = vld [vmem:[#allocation6 + $0x260] sm:$0xff] }
  0x4b   :  { %v753_v60 = vpack.c.bf16 %v145_v57, %v141_v56  ;;  %v149_v63 = vld [vmem:[#allocation6 + $0x288] sm:$0xff]  ;;  %v755_v1 = vpack.c.bf16 %v144_v62, %v140_v61  ;;  %v148_v3 = vld [vmem:[#allocation6 + $0x280] sm:$0xff]  ;;  %v394_v56 = vld [vmem:[#allocation8 + $0x98] sm:$0xff] }
  0x4c   :  { %736 = vmatpush1.bf16.msra.mxu1 %v735_v31  ;;  %v153_v0 = vld [vmem:[#allocation6 + $0x2a8] sm:$0xff]  ;;  %v152_v4 = vld [vmem:[#allocation6 + $0x2a0] sm:$0xff]  ;;  %v386_v31 = vld [vmem:[#allocation8 + $0x58] sm:$0xff] }
  0x4d   :  { %738 = vmatprep.subr.bf16.mxu1 %v737_v32  ;;  %v757_v2 = vpack.c.bf16 %v153_v0, %v149_v63  ;;  %v157_v5 = vld [vmem:[#allocation6 + $0x2c8] sm:$0xff]  ;;  %v759_v7 = vpack.c.bf16 %v152_v4, %v148_v3  ;;  %v156_v9 = vld [vmem:[#allocation6 + $0x2c0] sm:$0xff]  ;;  %v71_v63 = vld [vmem:[#allocation6 + $0x18] sm:$0xff] }
  0x4e   :  { %v161_v6 = vld [vmem:[#allocation6 + $0x2e8] sm:$0xff]  ;;  %v160_v10 = vld [vmem:[#allocation6 + $0x2e0] sm:$0xff]  ;;  %v75_v3 = vld [vmem:[#allocation6 + $0x38] sm:$0xff] }
  0x4f   :  { %v761_v8 = vpack.c.bf16 %v161_v6, %v157_v5  ;;  %v165_v11 = vld [vmem:[#allocation6 + $0x308] sm:$0xff]  ;;  %v164_v13 = vld [vmem:[#allocation6 + $0x300] sm:$0xff]  ;;  %v763_v16 = vpack.c.bf16 %v160_v10, %v156_v9  ;;  %v398_v5 = vld [vmem:[#allocation8 + $0xb8] sm:$0xff] }
  0x50   :  { %740 = vmatpush1.bf16.msra.mxu1 %v739_v37  ;;  %v169_v12 = vld [vmem:[#allocation6 + $0x328] sm:$0xff]  ;;  %v168_v14 = vld [vmem:[#allocation6 + $0x320] sm:$0xff]  ;;  %v70_v9 = vld [vmem:[#allocation6 + $0x10] sm:$0xff] }
  0x51   :  { %742 = vmatprep.subr.bf16.mxu1 %v741_v39  ;;  %v376_v15 = vld [vmem:[#allocation8 + $0x8] sm:$0xff]  ;;  %v375_v20 = vld [vmem:[#allocation8] sm:$0xff]  ;;  %v765_v22 = vpack.c.bf16 %v169_v12, %v165_v11  ;;  %v767_v32 = vpack.c.bf16 %v168_v14, %v164_v13  ;;  %v74_v10 = vld [vmem:[#allocation6 + $0x30] sm:$0xff] }
  0x52   :  { %v173_v17 = vld [vmem:[#allocation6 + $0x348] sm:$0xff]  ;;  %v845_v23 = vpack.c.bf16 %v378_v19, %v376_v15  ;;  %v847_v24 = vpack.c.bf16 %v377_v21, %v375_v20  ;;  %v379_v27 = vld [vmem:[#allocation8 + $0x20] sm:$0xff]  ;;  %v79_v11 = vld [vmem:[#allocation6 + $0x58] sm:$0xff] }
  0x53   :  { %v177_v18 = vld [vmem:[#allocation6 + $0x368] sm:$0xff]  ;;  %v172_v33 = vld [vmem:[#allocation6 + $0x340] sm:$0xff]  ;;  %v851_v35 = vpack.c.bf16 %v381_v29, %v379_v27  ;;  %v83_v13 = vld [vmem:[#allocation6 + $0x78] sm:$0xff] }
  0x54   :  { %744 = vmatpush1.bf16.msra.mxu1 %v743_v45  ;;  %v380_v25 = vld [vmem:[#allocation8 + $0x28] sm:$0xff]  ;;  %846 = vmatprep.subr.bf16.mxu0 %v845_v23  ;;  %v176_v34 = vld [vmem:[#allocation6 + $0x360] sm:$0xff]  ;;  %v769_v36 = vpack.c.bf16 %v177_v18, %v173_v17  ;;  %v397_v15 = vld [vmem:[#allocation8 + $0xb0] sm:$0xff]  ;;  %v783_v18 = vpack.c.bf16 %v74_v10, %v70_v9  ;;  %v785_v19 = vpack.c.bf16 %v83_v13, %v79_v11 }
  0x55   :  { %746 = vmatprep.subr.bf16.mxu1 %v745_v46  ;;  %v849_v28 = vpack.c.bf16 %v382_v26, %v380_v25  ;;  %v384_v30 = vld [vmem:[#allocation8 + $0x48] sm:$0xff]  ;;  %848 = vmatpush1.bf16.msra.mxu0 %v847_v24  ;;  %v383_v39 = vld [vmem:[#allocation8 + $0x40] sm:$0xff]  ;;  %v771_v44 = vpack.c.bf16 %v176_v34, %v172_v33  ;;  %v402_v17 = vld [vmem:[#allocation8 + $0xd8] sm:$0xff] }
  0x56   :  { %v181_v37 = vld [vmem:[#allocation6 + $0x388] sm:$0xff]  ;;  %v853_v38 = vpack.c.bf16 %v386_v31, %v384_v30  ;;  %v180_v45 = vld [vmem:[#allocation6 + $0x380] sm:$0xff]  ;;  %v855_v47 = vpack.c.bf16 %v385_v40, %v383_v39  ;;  %v78_v20 = vld [vmem:[#allocation6 + $0x50] sm:$0xff] }
  0x57   :  { %850 = vmatprep.subr.bf16.mxu0 %v849_v28  ;;  %v185_v41 = vld [vmem:[#allocation6 + $0x3a8] sm:$0xff]  ;;  %v184_v46 = vld [vmem:[#allocation6 + $0x3a0] sm:$0xff]  ;;  %v82_v21 = vld [vmem:[#allocation6 + $0x70] sm:$0xff] }
  0x58   :  { %748 = vmatpush1.bf16.msra.mxu1 %v747_v51  ;;  %v388_v42 = vld [vmem:[#allocation8 + $0x68] sm:$0xff]  ;;  %v773_v48 = vpack.c.bf16 %v185_v41, %v181_v37  ;;  %v387_v51 = vld [vmem:[#allocation8 + $0x60] sm:$0xff]  ;;  %v775_v57 = vpack.c.bf16 %v184_v46, %v180_v45  ;;  %v91_v24 = vld [vmem:[#allocation6 + $0xb8] sm:$0xff]  ;;  %v787_v30 = vpack.c.bf16 %v82_v21, %v78_v20 }
  0x59   :  { %750 = vmatprep.subr.bf16.mxu1 %v749_v52  ;;  %852 = vmatpush1.bf16.msra.mxu0 %v851_v35  ;;  %v189_v49 = vld [vmem:[#allocation6 + $0x3c8] sm:$0xff]  ;;  %v857_v50 = vpack.c.bf16 %v390_v43, %v388_v42  ;;  %v389_v52 = vld [vmem:[#allocation8 + $0x70] sm:$0xff]  ;;  %v395_v14 = vld [vmem:[#allocation8 + $0xa0] sm:$0xff] }
  0x5a   :  { %854 = vmatprep.subr.bf16.mxu0 %v853_v38  ;;  %v193_v53 = vld [vmem:[#allocation6 + $0x3e8] sm:$0xff]  ;;  %v859_v61 = vpack.c.bf16 %v389_v52, %v387_v51  ;;  %v867_v23 = vpack.c.bf16 %v397_v15, %v395_v14  ;;  %v399_v26 = vld [vmem:[#allocation8 + $0xc0] sm:$0xff]  ;;  %v401_v27 = vld [vmem:[#allocation8 + $0xd0] sm:$0xff] }
  0x5b   :  { %v392_v54 = vld [vmem:[#allocation8 + $0x88] sm:$0xff]  ;;  %v777_v62 = vpack.c.bf16 %v193_v53, %v189_v49  ;;  %v406_v29 = vld [vmem:[#allocation8 + $0xf8] sm:$0xff]  ;;  %v90_v33 = vld [vmem:[#allocation6 + $0xb0] sm:$0xff]  ;;  %v871_v35 = vpack.c.bf16 %v401_v27, %v399_v26 }
  0x5c   :  { %752 = vmatpush1.bf16.msra.mxu1 %v751_v59  ;;  %v188_v59 = vld [vmem:[#allocation6 + $0x3c0] sm:$0xff]  ;;  %v861_v0 = vpack.c.bf16 %v394_v56, %v392_v54  ;;  %v396_v4 = vld [vmem:[#allocation8 + $0xa8] sm:$0xff]  ;;  %v95_v34 = vld [vmem:[#allocation6 + $0xd8] sm:$0xff] }
  0x5d   :  { %754 = vmatprep.subr.bf16.mxu1 %v753_v60  ;;  %v192_v60 = vld [vmem:[#allocation6 + $0x3e0] sm:$0xff]  ;;  %856 = vmatpush1.bf16.msra.mxu0 %v855_v47  ;;  %v865_v12 = vpack.c.bf16 %v398_v5, %v396_v4  ;;  %v404_v28 = vld [vmem:[#allocation8 + $0xe8] sm:$0xff]  ;;  %v405_v39 = vld [vmem:[#allocation8 + $0xf0] sm:$0xff] }
  0x5e   :  { %858 = vmatprep.subr.bf16.mxu0 %v857_v50  ;;  %v779_v6 = vpack.c.bf16 %v192_v60, %v188_v59  ;;  %v873_v37 = vpack.c.bf16 %v406_v29, %v404_v28  ;;  %v403_v38 = vld [vmem:[#allocation8 + $0xe0] sm:$0xff]  ;;  %v408_v40 = vld [vmem:[#allocation8 + $0x108] sm:$0xff]  ;;  %v410_v41 = vld [vmem:[#allocation8 + $0x118] sm:$0xff] }
  0x5f   :  { %v103_v45 = vld [vmem:[#allocation6 + $0x118] sm:$0xff]  ;;  %v875_v46 = vpack.c.bf16 %v405_v39, %v403_v38  ;;  %v407_v49 = vld [vmem:[#allocation8 + $0x100] sm:$0xff]  ;;  %v409_v50 = vld [vmem:[#allocation8 + $0x110] sm:$0xff] }
  0x60   :  { %756 = vmatpush1.bf16.msra.mxu1 %v755_v1  ;;  %v391_v1 = vld [vmem:[#allocation8 + $0x80] sm:$0xff]  ;;  %v107_v47 = vld [vmem:[#allocation6 + $0x138] sm:$0xff]  ;;  %v412_v51 = vld [vmem:[#allocation8 + $0x128] sm:$0xff]  ;;  %v879_v60 = vpack.c.bf16 %v409_v50, %v407_v49 }
  0x61   :  { %758 = vmatprep.subr.bf16.mxu1 %v757_v2  ;;  %v393_v2 = vld [vmem:[#allocation8 + $0x90] sm:$0xff]  ;;  %860 = vmatpush1.bf16.msra.mxu0 %v859_v61  ;;  %v414_v52 = vld [vmem:[#allocation8 + $0x138] sm:$0xff]  ;;  %v797_v54 = vpack.c.bf16 %v107_v47, %v103_v45  ;;  %v415_v11 = vld [vmem:[#allocation8 + $0x140] sm:$0xff] }
  0x62   :  { %862 = vmatprep.subr.bf16.mxu0 %v861_v0  ;;  %v102_v56 = vld [vmem:[#allocation6 + $0x110] sm:$0xff]  ;;  %v111_v59 = vld [vmem:[#allocation6 + $0x158] sm:$0xff]  ;;  %v420_v13 = vld [vmem:[#allocation8 + $0x168] sm:$0xff] }
  0x63   :  { %v115_v61 = vld [vmem:[#allocation6 + $0x178] sm:$0xff]  ;;  %v413_v0 = vld [vmem:[#allocation8 + $0x130] sm:$0xff] }
  0x64   :  { %760 = vmatpush1.bf16.msra.mxu1 %v759_v7  ;;  %v863_v7 = vpack.c.bf16 %v393_v2, %v391_v1  ;;  %v416_v1 = vld [vmem:[#allocation8 + $0x148] sm:$0xff]  ;;  %v418_v2 = vld [vmem:[#allocation8 + $0x158] sm:$0xff]  ;;  %v801_v4 = vpack.c.bf16 %v115_v61, %v111_v59  ;;  %v110_v5 = vld [vmem:[#allocation6 + $0x150] sm:$0xff] }
  0x65   :  { %762 = vmatprep.subr.bf16.mxu1 %v761_v8  ;;  %v781_v8 = vpack.c.bf16 %v75_v3, %v71_v63  ;;  %v411_v63 = vld [vmem:[#allocation8 + $0x120] sm:$0xff]  ;;  %v123_v9 = vld [vmem:[#allocation6 + $0x1b8] sm:$0xff]  ;;  %v885_v10 = vpack.c.bf16 %v418_v2, %v416_v1  ;;  %v126_v27 = vld [vmem:[#allocation6 + $0x1d0] sm:$0xff] }
  0x66   :  { %864 = vmatpush1.bf16.msra.mxu0 %v863_v7  ;;  %v119_v7 = vld [vmem:[#allocation6 + $0x198] sm:$0xff]  ;;  %v130_v28 = vld [vmem:[#allocation6 + $0x1f0] sm:$0xff] }
  0x67   :  { %866 = vmatprep.subr.bf16.mxu0 %v865_v12  ;;  %v417_v12 = vld [vmem:[#allocation8 + $0x150] sm:$0xff]  ;;  %v422_v14 = vld [vmem:[#allocation8 + $0x178] sm:$0xff] }
  0x68   :  { %764 = vmatpush1.bf16.msra.mxu1 %v763_v16  ;;  %v400_v16 = vld [vmem:[#allocation8 + $0xc8] sm:$0xff]  ;;  %v887_v20 = vpack.c.bf16 %v417_v12, %v415_v11  ;;  %v131_v21 = vld [vmem:[#allocation6 + $0x1f8] sm:$0xff]  ;;  %v150_v45 = vld [vmem:[#allocation6 + $0x290] sm:$0xff] }
  0x69   :  { %766 = vmatprep.subr.bf16.mxu1 %v765_v22  ;;  %v87_v22 = vld [vmem:[#allocation6 + $0x98] sm:$0xff]  ;;  %v869_v25 = vpack.c.bf16 %v402_v17, %v400_v16  ;;  %v805_v16 = vpack.c.bf16 %v123_v9, %v119_v7  ;;  %v118_v17 = vld [vmem:[#allocation6 + $0x190] sm:$0xff] }
  0x6a   :  { %v789_v31 = vpack.c.bf16 %v91_v24, %v87_v22  ;;  %868 = vmatpush1.bf16.msra.mxu0 %v867_v23  ;;  %v889_v22 = vpack.c.bf16 %v422_v14, %v420_v13  ;;  %v419_v23 = vld [vmem:[#allocation8 + $0x160] sm:$0xff]  ;;  %v421_v24 = vld [vmem:[#allocation8 + $0x170] sm:$0xff]  ;;  %v159_v47 = vld [vmem:[#allocation6 + $0x2d8] sm:$0xff] }
  0x6b   :  { %870 = vmatprep.subr.bf16.mxu0 %v869_v25  ;;  %v891_v29 = vpack.c.bf16 %v421_v24, %v419_v23  ;;  %v166_v59 = vld [vmem:[#allocation6 + $0x310] sm:$0xff]  ;;  %v175_v61 = vld [vmem:[#allocation6 + $0x358] sm:$0xff] }
  0x6c   :  { %768 = vmatpush1.bf16.msra.mxu1 %v767_v32  ;;  %v86_v32 = vld [vmem:[#allocation6 + $0x90] sm:$0xff]  ;;  %v191_v9 = vld [vmem:[#allocation6 + $0x3d8] sm:$0xff] }
  0x6d   :  { %770 = vmatprep.subr.bf16.mxu1 %v769_v36  ;;  %v99_v36 = vld [vmem:[#allocation6 + $0xf8] sm:$0xff]  ;;  %v791_v42 = vpack.c.bf16 %v90_v33, %v86_v32  ;;  %v811_v32 = vpack.c.bf16 %v130_v28, %v126_v27  ;;  %v174_v1 = vld [vmem:[#allocation6 + $0x350] sm:$0xff]  ;;  %v432_v28 = vld [vmem:[#allocation8 + $0x1c8] sm:$0xff] }
  0x6e   :  { %v793_v43 = vpack.c.bf16 %v99_v36, %v95_v34  ;;  %872 = vmatpush1.bf16.msra.mxu0 %v871_v35  ;;  %v134_v34 = vld [vmem:[#allocation6 + $0x210] sm:$0xff]  ;;  %v143_v36 = vld [vmem:[#allocation6 + $0x258] sm:$0xff] }
  0x6f   :  { %874 = vmatprep.subr.bf16.mxu0 %v873_v37  ;;  %v138_v35 = vld [vmem:[#allocation6 + $0x230] sm:$0xff]  ;;  %v147_v37 = vld [vmem:[#allocation6 + $0x278] sm:$0xff] }
  0x70   :  { %772 = vmatpush1.bf16.msra.mxu1 %v771_v44  ;;  %v94_v44 = vld [vmem:[#allocation6 + $0xd0] sm:$0xff]  ;;  %v815_v38 = vpack.c.bf16 %v138_v35, %v134_v34  ;;  %v817_v39 = vpack.c.bf16 %v147_v37, %v143_v36  ;;  %v430_v23 = vld [vmem:[#allocation8 + $0x1b8] sm:$0xff]  ;;  %v435_v36 = vld [vmem:[#allocation8 + $0x1e0] sm:$0xff] }
  0x71   :  { %774 = vmatprep.subr.bf16.mxu1 %v773_v48  ;;  %v877_v48 = vpack.c.bf16 %v410_v41, %v408_v40  ;;  %v142_v40 = vld [vmem:[#allocation6 + $0x250] sm:$0xff] }
  0x72   :  { %876 = vmatpush1.bf16.msra.mxu0 %v875_v46  ;;  %v146_v41 = vld [vmem:[#allocation6 + $0x270] sm:$0xff] }
  0x73   :  { %878 = vmatprep.subr.bf16.mxu0 %v877_v48  ;;  %v154_v46 = vld [vmem:[#allocation6 + $0x2b0] sm:$0xff]  ;;  %v163_v48 = vld [vmem:[#allocation6 + $0x2f8] sm:$0xff] }
  0x74   :  { %776 = vmatpush1.bf16.msra.mxu1 %v775_v57  ;;  %v106_v57 = vld [vmem:[#allocation6 + $0x130] sm:$0xff]  ;;  %v823_v49 = vpack.c.bf16 %v154_v46, %v150_v45  ;;  %v825_v50 = vpack.c.bf16 %v163_v48, %v159_v47 }
  0x75   :  { %778 = vmatprep.subr.bf16.mxu1 %v777_v62  ;;  %v881_v62 = vpack.c.bf16 %v414_v52, %v412_v51  ;;  %v799_v3 = vpack.c.bf16 %v106_v57, %v102_v56  ;;  %v158_v51 = vld [vmem:[#allocation6 + $0x2d0] sm:$0xff] }
  0x76   :  { %880 = vmatpush1.bf16.msra.mxu0 %v879_v60  ;;  %v162_v52 = vld [vmem:[#allocation6 + $0x2f0] sm:$0xff] }
  0x77   :  { %882 = vmatprep.subr.bf16.mxu0 %v881_v62  ;;  %v827_v56 = vpack.c.bf16 %v162_v52, %v158_v51  ;;  %v170_v60 = vld [vmem:[#allocation6 + $0x330] sm:$0xff]  ;;  %v179_v62 = vld [vmem:[#allocation6 + $0x378] sm:$0xff]  ;;  %v439_v52 = vld [vmem:[#allocation8 + $0x200] sm:$0xff] }
  0x78   :  { %780 = vmatpush1.bf16.msra.mxu1 %v779_v6  ;;  %v114_v6 = vld [vmem:[#allocation6 + $0x170] sm:$0xff] }
  0x79   :  { %782 = vmatprep.subr.bf16.mxu1 %v781_v8  ;;  %v883_v8 = vpack.c.bf16 %v413_v0, %v411_v63  ;;  %v803_v15 = vpack.c.bf16 %v114_v6, %v110_v5  ;;  %v831_v63 = vpack.c.bf16 %v170_v60, %v166_v59  ;;  %v833_v0 = vpack.c.bf16 %v179_v62, %v175_v61  ;;  %v178_v2 = vld [vmem:[#allocation6 + $0x370] sm:$0xff]  ;;  %v443_v62 = vld [vmem:[#allocation8 + $0x220] sm:$0xff] }
  0x7a   :  { %v835_v5 = vpack.c.bf16 %v178_v2, %v174_v1  ;;  %v182_v7 = vld [vmem:[#allocation6 + $0x390] sm:$0xff]  ;;  %v450_v1 = vld [vmem:[#allocation8 + $0x258] sm:$0xff] }
  0x7b   :  { %294 = vmatmul.mubr.f32.vlgmr.msra.gmra.mrb[0].mxu1 %v1177_v55  ;;  %884 = vmatpush1.bf16.msra.mxu0 %v883_v8  ;;  %v186_v8 = vld [vmem:[#allocation6 + $0x3b0] sm:$0xff] }
  0x7c   :  { %784 = vmatpush1.bf16.msra.mxu1 %v783_v18  ;;  %364 = vmatprep.mubr.f32.mxu1 %v1181_v58  ;;  %v98_v58 = vld [vmem:[#allocation6 + $0xf0] sm:$0xff]  ;;  %v839_v11 = vpack.c.bf16 %v186_v8, %v182_v7  ;;  %v454_v7 = vld [vmem:[#allocation8 + $0x278] sm:$0xff] }
  0x7d   :  { %786 = vmatprep.subr.bf16.mxu1 %v785_v19  ;;  %v795_v53 = vpack.c.bf16 %v98_v58, %v94_v44  ;;  %v122_v18 = vld [vmem:[#allocation6 + $0x1b0] sm:$0xff]  ;;  %v127_v19 = vld [vmem:[#allocation6 + $0x1d8] sm:$0xff]  ;;  %886 = vmatprep.subr.bf16.mxu0 %v885_v10  ;;  %v819_v44 = vpack.c.bf16 %v146_v41, %v142_v40 }
  0x7e   :  { %v807_v25 = vpack.c.bf16 %v122_v18, %v118_v17  ;;  %v809_v26 = vpack.c.bf16 %v131_v21, %v127_v19  ;;  %v195_v10 = vld [vmem:[#allocation6 + $0x3f8] sm:$0xff]  ;;  %v190_v13 = vld [vmem:[#allocation6 + $0x3d0] sm:$0xff]  ;;  %v423_v19 = vld [vmem:[#allocation8 + $0x180] sm:$0xff] }
  0x7f   :  { %888 = vmatpush1.bf16.msra.mxu0 %v887_v20  ;;  %v841_v12 = vpack.c.bf16 %v195_v10, %v191_v9  ;;  %v194_v14 = vld [vmem:[#allocation6 + $0x3f0] sm:$0xff]  ;;  %v426_v17 = vld [vmem:[#allocation8 + $0x198] sm:$0xff]  ;;  %v451_v10 = vld [vmem:[#allocation8 + $0x260] sm:$0xff] }
  0x80   :  { %788 = vmatpush1.bf16.msra.mxu1 %v787_v30  ;;  %v135_v30 = vld [vmem:[#allocation6 + $0x218] sm:$0xff]  ;;  %890 = vmatprep.subr.bf16.mxu0 %v889_v22  ;;  %v425_v20 = vld [vmem:[#allocation8 + $0x190] sm:$0xff]  ;;  %v428_v22 = vld [vmem:[#allocation8 + $0x1a8] sm:$0xff] }
  0x81   :  { %790 = vmatprep.subr.bf16.mxu1 %v789_v31  ;;  %v139_v31 = vld [vmem:[#allocation6 + $0x238] sm:$0xff]  ;;  %v895_v21 = vpack.c.bf16 %v425_v20, %v423_v19  ;;  %v897_v24 = vpack.c.bf16 %v430_v23, %v428_v22  ;;  %v437_v37 = vld [vmem:[#allocation8 + $0x1f0] sm:$0xff]  ;;  %v459_v22 = vld [vmem:[#allocation8 + $0x2a0] sm:$0xff] }
  0x82   :  { %v813_v33 = vpack.c.bf16 %v139_v31, %v135_v30  ;;  %v431_v30 = vld [vmem:[#allocation8 + $0x1c0] sm:$0xff]  ;;  %v433_v31 = vld [vmem:[#allocation8 + $0x1d0] sm:$0xff]  ;;  %v442_v40 = vld [vmem:[#allocation8 + $0x218] sm:$0xff] }
  0x83   :  { %892 = vmatpush1.bf16.msra.mxu0 %v891_v29  ;;  %v434_v29 = vld [vmem:[#allocation8 + $0x1d8] sm:$0xff]  ;;  %v903_v34 = vpack.c.bf16 %v433_v31, %v431_v30  ;;  %v461_v23 = vld [vmem:[#allocation8 + $0x2b0] sm:$0xff]  ;;  %v468_v30 = vld [vmem:[#allocation8 + $0x2e8] sm:$0xff] }
  0x84   :  { %792 = vmatpush1.bf16.msra.mxu1 %v791_v42  ;;  %v151_v42 = vld [vmem:[#allocation6 + $0x298] sm:$0xff] }
  0x85   :  { %794 = vmatprep.subr.bf16.mxu1 %v793_v43  ;;  %v155_v43 = vld [vmem:[#allocation6 + $0x2b8] sm:$0xff] }
  0x86   :  { %v821_v58 = vpack.c.bf16 %v155_v43, %v151_v42  ;;  %v198_v42 = vlaneseq  ;;  %v462_v19 = vld [vmem:[#allocation8 + $0x2b8] sm:$0xff] }
  0x88   :  { %796 = vmatpush1.bf16.msra.mxu1 %v795_v53  ;;  %v167_v53 = vld [vmem:[#allocation6 + $0x318] sm:$0xff]  ;;  %v1187_v43 = vshrl.u32 %v198_v42, 7 }
  0x89   :  { %798 = vmatprep.subr.bf16.mxu1 %v797_v54  ;;  %v171_v54 = vld [vmem:[#allocation6 + $0x338] sm:$0xff] }
  0x8a   :  { %v829_v57 = vpack.c.bf16 %v171_v54, %v167_v53  ;;  %v204_v45 = vsub.s32 1, %v1187_v43  ;;  %v441_v53 = vld [vmem:[#allocation8 + $0x210] sm:$0xff]  ;;  %v444_v54 = vld [vmem:[#allocation8 + $0x228] sm:$0xff]  ;;  %v478_v42 = vld [vmem:[#allocation8 + $0x338] sm:$0xff] }
  0x8b   :  { %v911_v59 = vpack.c.bf16 %v441_v53, %v439_v52 }
  0x8c   :  { %800 = vmatpush1.bf16.msra.mxu1 %v799_v3  ;;  %v183_v3 = vld [vmem:[#allocation6 + $0x398] sm:$0xff] }
  0x8d   :  { %802 = vmatprep.subr.bf16.mxu1 %v801_v4  ;;  %v187_v4 = vld [vmem:[#allocation6 + $0x3b8] sm:$0xff] }
  0x8e   :  { %v837_v6 = vpack.c.bf16 %v187_v4, %v183_v3  ;;  %v447_v4 = vld [vmem:[#allocation8 + $0x240] sm:$0xff] }
  0x90   :  { %804 = vmatpush1.bf16.msra.mxu1 %v803_v15  ;;  %v843_v15 = vpack.c.bf16 %v194_v14, %v190_v13  ;;  %v458_v13 = vld [vmem:[#allocation8 + $0x298] sm:$0xff] }
  0x91   :  { %806 = vmatprep.subr.bf16.mxu1 %v805_v16  ;;  %v424_v16 = vld [vmem:[#allocation8 + $0x188] sm:$0xff] }
  0x92   :  { %v893_v18 = vpack.c.bf16 %v426_v17, %v424_v16  ;;  %v455_v16 = vld [vmem:[#allocation8 + $0x280] sm:$0xff]  ;;  %v457_v17 = vld [vmem:[#allocation8 + $0x290] sm:$0xff] }
  0x93   :  { %v927_v20 = vpack.c.bf16 %v457_v17, %v455_v16  ;;  %v496_v16 = vld [vmem:[#allocation8 + $0x3c8] sm:$0xff]  ;;  %v498_v17 = vld [vmem:[#allocation8 + $0x3d8] sm:$0xff] }
  0x94   :  { %808 = vmatpush1.bf16.msra.mxu1 %v807_v25  ;;  %894 = vmatprep.subr.bf16.mxu0 %v893_v18  ;;  %v427_v25 = vld [vmem:[#allocation8 + $0x1a0] sm:$0xff]  ;;  %v460_v18 = vld [vmem:[#allocation8 + $0x2a8] sm:$0xff] }
  0x95   :  { %810 = vmatprep.subr.bf16.mxu1 %v809_v26  ;;  %896 = vmatpush1.bf16.msra.mxu0 %v895_v21  ;;  %v429_v26 = vld [vmem:[#allocation8 + $0x1b0] sm:$0xff]  ;;  %v929_v21 = vpack.c.bf16 %v462_v19, %v460_v18 }
  0x96   :  { %v899_v27 = vpack.c.bf16 %v429_v26, %v427_v25  ;;  %898 = vmatprep.subr.bf16.mxu0 %v897_v24  ;;  %v464_v24 = vld [vmem:[#allocation8 + $0x2c8] sm:$0xff]  ;;  %v466_v25 = vld [vmem:[#allocation8 + $0x2d8] sm:$0xff]  ;;  %v931_v26 = vpack.c.bf16 %v461_v23, %v459_v22  ;;  %v965_v23 = vpack.c.bf16 %v498_v17, %v496_v16 }
  0x98   :  { %812 = vmatpush1.bf16.msra.mxu1 %v811_v32  ;;  %v436_v32 = vld [vmem:[#allocation8 + $0x1e8] sm:$0xff] }
  0x99   :  { %814 = vmatprep.subr.bf16.mxu1 %v813_v33  ;;  %900 = vmatpush1.bf16.msra.mxu0 %v899_v27  ;;  %v438_v33 = vld [vmem:[#allocation8 + $0x1f8] sm:$0xff]  ;;  %v933_v27 = vpack.c.bf16 %v466_v25, %v464_v24  ;;  %v495_v24 = vld [vmem:[#allocation8 + $0x3c0] sm:$0xff]  ;;  %v497_v25 = vld [vmem:[#allocation8 + $0x3d0] sm:$0xff] }
  0x9a   :  { %v905_v35 = vpack.c.bf16 %v438_v33, %v436_v32  ;;  %v467_v33 = vld [vmem:[#allocation8 + $0x2e0] sm:$0xff] }
  0x9c   :  { %816 = vmatpush1.bf16.msra.mxu1 %v815_v38  ;;  %v907_v38 = vpack.c.bf16 %v437_v37, %v435_v36  ;;  %v474_v36 = vld [vmem:[#allocation8 + $0x318] sm:$0xff] }
  0x9d   :  { %818 = vmatprep.subr.bf16.mxu1 %v817_v39  ;;  %v440_v39 = vld [vmem:[#allocation8 + $0x208] sm:$0xff] }
  0x9e   :  { %v909_v41 = vpack.c.bf16 %v442_v40, %v440_v39  ;;  %v471_v39 = vld [vmem:[#allocation8 + $0x300] sm:$0xff]  ;;  %v473_v40 = vld [vmem:[#allocation8 + $0x310] sm:$0xff] }
  0xa0   :  { %820 = vmatpush1.bf16.msra.mxu1 %v819_v44  ;;  %v200_v44 = vsub.s32 0, %v1187_v43 }
  0xa1   :  { %822 = vmatprep.subr.bf16.mxu1 %v821_v58  ;;  %v1193_v58 = vld [vmem:[%s1228_s3] sm:$0xf] }
  0xa2   :  { %v201_v46 = vrot.slane %v1193_v58, %v200_v44  ;;  %v205_v47 = vrot.slane %v1193_v58, %v204_v45 }
  0xa4   :  { %824 = vmatpush1.bf16.msra.mxu1 %v823_v49 }
  0xa5   :  { %826 = vmatprep.subr.bf16.mxu1 %v825_v50 }
  0xa8   :  { %828 = vmatpush1.bf16.msra.mxu1 %v827_v56  ;;  %v446_v56 = vld [vmem:[#allocation8 + $0x238] sm:$0xff] }
  0xa9   :  { %830 = vmatprep.subr.bf16.mxu1 %v829_v57  ;;  %v913_v61 = vpack.c.bf16 %v446_v56, %v444_v54  ;;  %v479_v54 = vld [vmem:[#allocation8 + $0x340] sm:$0xff]  ;;  %v481_v56 = vld [vmem:[#allocation8 + $0x350] sm:$0xff] }
  0xac   :  { %832 = vmatpush1.bf16.msra.mxu1 %v831_v63  ;;  %v445_v63 = vld [vmem:[#allocation8 + $0x230] sm:$0xff] }
  0xad   :  { %834 = vmatprep.subr.bf16.mxu1 %v833_v0  ;;  %v448_v0 = vld [vmem:[#allocation8 + $0x248] sm:$0xff]  ;;  %v915_v2 = vpack.c.bf16 %v445_v63, %v443_v62  ;;  %v483_v62 = vld [vmem:[#allocation8 + $0x360] sm:$0xff]  ;;  %v485_v63 = vld [vmem:[#allocation8 + $0x370] sm:$0xff] }
  0xae   :  { %v917_v3 = vpack.c.bf16 %v450_v1, %v448_v0  ;;  %v488_v0 = vld [vmem:[#allocation8 + $0x388] sm:$0xff]  ;;  %v490_v1 = vld [vmem:[#allocation8 + $0x398] sm:$0xff] }
  0xb0   :  { %836 = vmatpush1.bf16.msra.mxu1 %v835_v5  ;;  %v449_v5 = vld [vmem:[#allocation8 + $0x250] sm:$0xff] }
  0xb1   :  { %838 = vmatprep.subr.bf16.mxu1 %v837_v6  ;;  %v452_v6 = vld [vmem:[#allocation8 + $0x268] sm:$0xff]  ;;  %v919_v8 = vpack.c.bf16 %v449_v5, %v447_v4  ;;  %v957_v4 = vpack.c.bf16 %v490_v1, %v488_v0  ;;  %v212_v5 = vsub.s32 3, %v1187_v43 }
  0xb2   :  { %v921_v9 = vpack.c.bf16 %v454_v7, %v452_v6  ;;  %v487_v6 = vld [vmem:[#allocation8 + $0x380] sm:$0xff]  ;;  %v489_v7 = vld [vmem:[#allocation8 + $0x390] sm:$0xff] }
  0xb4   :  { %840 = vmatpush1.bf16.msra.mxu1 %v839_v11  ;;  %v453_v11 = vld [vmem:[#allocation8 + $0x270] sm:$0xff] }
  0xb5   :  { %842 = vmatprep.subr.bf16.mxu1 %v841_v12  ;;  %v456_v12 = vld [vmem:[#allocation8 + $0x288] sm:$0xff]  ;;  %v923_v14 = vpack.c.bf16 %v453_v11, %v451_v10  ;;  %v959_v11 = vpack.c.bf16 %v489_v7, %v487_v6 }
  0xb8   :  { %844 = vmatpush1.bf16.msra.mxu1 %v843_v15  ;;  %v925_v15 = vpack.c.bf16 %v458_v13, %v456_v12  ;;  %v213_v12 = vrot.slane %v1193_v58, %v212_v5 }
  0xbb   :  { %365 = vmatmul.mubr.f32.vlgmr.msra.gmra.mrb[2].mxu1 %v1177_v55  ;;  %v901_v55 = vpack.c.bf16 %v434_v29, %v432_v28  ;;  %v463_v28 = vld [vmem:[#allocation8 + $0x2c0] sm:$0xff]  ;;  %v465_v29 = vld [vmem:[#allocation8 + $0x2d0] sm:$0xff] }
  0xbc   :  { %v935_v31 = vpack.c.bf16 %v465_v29, %v463_v28  ;;  %v499_v29 = vld [vmem:[#allocation8 + $0x3e0] sm:$0xff] }
  0xbd   :  { %902 = vmatprep.subr.bf16.mxu0 %v901_v55  ;;  %v470_v55 = vld [vmem:[#allocation8 + $0x2f8] sm:$0xff] }
  0xbe   :  { %904 = vmatpush1.bf16.msra.mxu0 %v903_v34  ;;  %v937_v32 = vpack.c.bf16 %v470_v55, %v468_v30  ;;  %v469_v34 = vld [vmem:[#allocation8 + $0x2f0] sm:$0xff] }
  0xbf   :  { %906 = vmatprep.subr.bf16.mxu0 %v905_v35  ;;  %v472_v35 = vld [vmem:[#allocation8 + $0x308] sm:$0xff]  ;;  %v939_v37 = vpack.c.bf16 %v469_v34, %v467_v33  ;;  %v501_v30 = vld [vmem:[#allocation8 + $0x3f0] sm:$0xff] }
  0xc0   :  { %v971_v55 = vpack.c.bf16 %v501_v30, %v499_v29  ;;  %v503_v33 = vld [vmem:[%s1230_s5] sm:$0x3]  ;;  %s1102_s5 = smov [#allocation9]  }
  0xc1   :  { %v508_v34 = vrot.slane %v503_v33, %v200_v44  ;;  %s705_s14 = sshll.u32 %s1102_s5, 4  ;;  %s706_s14 = int_to_ptr.vmem [resolvable:$true] %s705_s14 }
  0xc2   :  { %908 = vmatpush1.bf16.msra.mxu0 %v907_v38  ;;  %v941_v38 = vpack.c.bf16 %v474_v36, %v472_v35  ;;  %v512_v35 = vrot.slane %v503_v33, %v204_v45  ;;  %s1067_s15 = scalar_lea.vmem %s706_s14, 64  ;;  %p1072_p11 = scmp.lt.s32.totalorder %s706_s14, %s706_s14 }
  0xc3   :  { %910 = vmatprep.subr.bf16.mxu0 %v909_v41  ;;  %v476_v41 = vld [vmem:[#allocation8 + $0x328] sm:$0xff]  ;;  %p1068_p10 = scmp.ne.s32.totalorder %s706_s14, %s1067_s15  ;;  %p1073_p12 = scmp.lt.s32.totalorder %s1067_s15, %s1067_s15 }
  0xc5   :  { %p1074_p13 = por %p1073_p12, %p1072_p11 }
  0xc7   :  { %p1075_p0 = pnand %p1074_p13, %p1068_p10 }
 0x14e   :  { %v295_v48 = vpop.f32.mrb[0].mxu1 }
 0x14f   :  { %v296_v49 = vadd.f32 %v295_v48, %v201_v46  ;;  %v297_v50 = vpop.f32.mrb[1].mxu1  ;;  %v943_v46 = vpack.c.bf16 %v473_v40, %v471_v39  ;;  %v475_v48 = vld [vmem:[#allocation8 + $0x320] sm:$0xff] }
 0x150   :  { %v298_v51 = vadd.f32 %v297_v50, %v205_v47  ;;  %v945_v47 = vpack.c.bf16 %v478_v42, %v476_v41  ;;  %v480_v50 = vld [vmem:[#allocation8 + $0x348] sm:$0xff] }
 0x151   :  { %985 = vtanh.f32 %v296_v49  ;;  %v477_v49 = vld [vmem:[#allocation8 + $0x330] sm:$0xff] }
 0x152   :  { %987 = vtanh.f32 %v298_v51  ;;  %v482_v51 = vld [vmem:[#allocation8 + $0x358] sm:$0xff]  ;;  %v947_v52 = vpack.c.bf16 %v477_v49, %v475_v48 }
 0x153   :  { %v949_v53 = vpack.c.bf16 %v482_v51, %v480_v50 }
 0x15b   :  { %v986_v57 = vpop.eup %985 }
 0x15c   :  { %v988_v60 = vpop.eup %987 }
 0x15d   :  { %579 = vmatprep.mubr.f32.mxu0 %v988_v60  ;;  %v951_v60 = vpack.c.bf16 %v481_v56, %v479_v54 }
 0x15e   :  { %580 = vmatmul.mubr.f32.vlgmr.msra.gmra.mrb[0].mxu0 %v986_v57  ;;  %v484_v57 = vld [vmem:[#allocation8 + $0x368] sm:$0xff] }
 0x15f   :  { %912 = vmatpush1.bf16.msra.mxu0 %v911_v59  ;;  %v486_v59 = vld [vmem:[#allocation8 + $0x378] sm:$0xff] }
 0x160   :  { %914 = vmatprep.subr.bf16.mxu0 %v913_v61  ;;  %v953_v61 = vpack.c.bf16 %v486_v59, %v484_v57 }
 0x163   :  { %916 = vmatpush1.bf16.msra.mxu0 %v915_v2  ;;  %v955_v2 = vpack.c.bf16 %v485_v63, %v483_v62 }
 0x164   :  { %918 = vmatprep.subr.bf16.mxu0 %v917_v3  ;;  %v208_v3 = vsub.s32 2, %v1187_v43 }
 0x166   :  { %v209_v10 = vrot.slane %v1193_v58, %v208_v3  ;;  %v967_v58 = vpack.c.bf16 %v497_v25, %v495_v24 }
 0x167   :  { %920 = vmatpush1.bf16.msra.mxu0 %v919_v8  ;;  %v492_v8 = vld [vmem:[#allocation8 + $0x3a8] sm:$0xff] }
 0x168   :  { %922 = vmatprep.subr.bf16.mxu0 %v921_v9  ;;  %v494_v9 = vld [vmem:[#allocation8 + $0x3b8] sm:$0xff] }
 0x169   :  { %v961_v13 = vpack.c.bf16 %v494_v9, %v492_v8 }
 0x16b   :  { %924 = vmatpush1.bf16.msra.mxu0 %v923_v14  ;;  %v491_v14 = vld [vmem:[#allocation8 + $0x3a0] sm:$0xff] }
 0x16c   :  { %926 = vmatprep.subr.bf16.mxu0 %v925_v15  ;;  %v493_v15 = vld [vmem:[#allocation8 + $0x3b0] sm:$0xff] }
 0x16f   :  { %928 = vmatpush1.bf16.msra.mxu0 %v927_v20 }
 0x170   :  { %930 = vmatprep.subr.bf16.mxu0 %v929_v21  ;;  %v963_v21 = vpack.c.bf16 %v493_v15, %v491_v14 }
 0x173   :  { %932 = vmatpush1.bf16.msra.mxu0 %v931_v26  ;;  %v500_v26 = vld [vmem:[#allocation8 + $0x3e8] sm:$0xff] }
 0x174   :  { %934 = vmatprep.subr.bf16.mxu0 %v933_v27  ;;  %v502_v27 = vld [vmem:[#allocation8 + $0x3f8] sm:$0xff] }
 0x175   :  { %v969_v28 = vpack.c.bf16 %v502_v27, %v500_v26 }
 0x177   :  { %936 = vmatpush1.bf16.msra.mxu0 %v935_v31 }
 0x178   :  { %938 = vmatprep.subr.bf16.mxu0 %v937_v32 }
 0x17b   :  { %940 = vmatpush1.bf16.msra.mxu0 %v939_v37 }
 0x17c   :  { %942 = vmatprep.subr.bf16.mxu0 %v941_v38 }
 0x17f   :  { %944 = vmatpush1.bf16.msra.mxu0 %v943_v46 }
 0x180   :  { %946 = vmatprep.subr.bf16.mxu0 %v945_v47 }
 0x183   :  { %948 = vmatpush1.bf16.msra.mxu0 %v947_v52 }
 0x184   :  { %950 = vmatprep.subr.bf16.mxu0 %v949_v53 }
 0x187   :  { %952 = vmatpush1.bf16.msra.mxu0 %v951_v60 }
 0x188   :  { %954 = vmatprep.subr.bf16.mxu0 %v953_v61 }
 0x18b   :  { %956 = vmatpush1.bf16.msra.mxu0 %v955_v2 }
 0x18c   :  { %958 = vmatprep.subr.bf16.mxu0 %v957_v4 }
 0x18e   :  { %v366_v18 = vpop.f32.mrb[2].mxu1 }
 0x18f   :  { %v367_v19 = vadd.f32 %v366_v18, %v209_v10  ;;  %v368_v20 = vpop.f32.mrb[3].mxu1  ;;  %960 = vmatpush1.bf16.msra.mxu0 %v959_v11 }
 0x190   :  { %v369_v22 = vadd.f32 %v368_v20, %v213_v12  ;;  %962 = vmatprep.subr.bf16.mxu0 %v961_v13 }
 0x192   :  { %989 = vtanh.f32 %v369_v22 }
 0x193   :  { %991 = vtanh.f32 %v367_v19  ;;  %964 = vmatpush1.bf16.msra.mxu0 %v963_v21 }
 0x194   :  { %966 = vmatprep.subr.bf16.mxu0 %v965_v23 }
 0x197   :  { %968 = vmatpush1.bf16.msra.mxu0 %v967_v58 }
 0x198   :  { %970 = vmatprep.subr.bf16.mxu0 %v969_v28 }
 0x19b   :  { %972 = vmatpush1.bf16.msra.mxu0 %v971_v55 }
 0x19c   :  { %v990_v31 = vpop.eup %989 }
 0x19d   :  { %v992_v32 = vpop.eup %991  ;;  %650 = vmatprep.mubr.f32.mxu0 %v990_v31 }
 0x19e   :  { %651 = vmatmul.mubr.f32.vlgmr.msra.gmra.mrb[0].mxu0 %v992_v32 }
 0x271   :  { %v652_v36 = vpop.f32.mrb[0].mxu0 }
 0x272   :  { %v973_v37 = vadd.f32 %v652_v36, %v508_v34  ;;  %v654_v38 = vpop.f32.mrb[1].mxu0 }
 0x273   :  { %v974_v39 = vadd.f32 %v654_v38, %v512_v35 }
 0x274   :  { %v659_v40 = vand.u32 2147483647, %v973_v37  ;;  %v657_v62 = vmax.f32 %v973_v37, 0.0 }
 0x275   :  { %v660_v41 = vand.u32 2147483647, %v974_v39  ;;  %v658_v2 = vmax.f32 %v974_v39, 0.0 }
 0x276   :  { %v661_v42 = vsub.f32 0.0, %v659_v40 }
 0x277   :  { %v662_v46 = vsub.f32 0.0, %v660_v41 }
 0x278   :  { %v663_v47 = vmul.f32 1.442695, %v661_v42 }
 0x279   :  { %v665_v48 = vmul.f32 1.442695, %v662_v46 }
 0x27a   :  { %993 = vpow2.f32 %v663_v47 }
 0x27b   :  { %995 = vpow2.f32 %v665_v48 }
 0x284   :  { %v994_v49 = vpop.eup %993 }
 0x285   :  { %v996_v50 = vpop.eup %995  ;;  %v667_v51 = vadd.f32 1.0, %v994_v49  ;;  %v670_v43 = vmul.f32 -0.5, %v994_v49  ;;  %v673_v53 = vand.u32 2147483647, %v994_v49 }
 0x286   :  { %v676_v52 = vadd.f32 1.0, %v996_v50  ;;  %v679_v44 = vmul.f32 -0.5, %v996_v50  ;;  %v682_v56 = vand.u32 2147483647, %v996_v50 }
 0x287   :  { %997 = vlog2.f32 %v667_v51  ;;  %v671_v45 = vadd.f32 1.0, %v670_v43  ;;  %vm674_vm0 = vcmp.lt.f32.partialorder %v673_v53, 0.0004427343 }
 0x288   :  { %999 = vlog2.f32 %v676_v52  ;;  %v680_v54 = vadd.f32 1.0, %v679_v44  ;;  %vm683_vm1 = vcmp.lt.f32.partialorder %v682_v56, 0.0004427343 }
 0x289   :  { %v672_v61 = vmul.f32 %v994_v49, %v671_v45 }
 0x28a   :  { %v681_v0 = vmul.f32 %v996_v50, %v680_v54 }
 0x291   :  { %v998_v57 = vpop.eup %997 }
 0x292   :  { %v1000_v59 = vpop.eup %999  ;;  %v669_v60 = vmul.f32 0.6931472, %v998_v57 }
 0x293   :  { %v678_v63 = vmul.f32 0.6931472, %v1000_v59 }
 0x294   :  { %v675_v1 = vsel %vm674_vm0, %v672_v61, %v669_v60 }
 0x295   :  { %v685_v3 = vadd.f32 %v675_v1, %v657_v62  ;;  %v684_v4 = vsel %vm683_vm1, %v681_v0, %v678_v63 }
 0x296   :  { %v686_v5 = vadd.f32 %v684_v4, %v658_v2 }
 0x298   :  { %v689_v6 = vcombine.low %v685_v3, %v686_v5 }
 0x29a   :  { %716 = vst.sshfl [vmem:[#allocation9] sm:$0x33 pattern:$0x76325410] %v689_v6 }
 0x29b   :  { %1078 = shalt.err (!%p1075_p0)
}
 0x29c   :  { %s1079_s18 = scalar_lea.hbm %s1231_s6, 64 }
 0x29d   :  { %p1080_p1 = scmp.ne.s32.totalorder %s1231_s6, %s1079_s18  ;;  %p1083_p2 = scmp.lt.u32.totalorder %s1079_s18, %s1231_s6 }
 0x29f   :  { %p1085_p3 = pnand %p1083_p2, %p1080_p1 }
 0x2a1   :  { %1088 = shalt.err (!%p1085_p3)
}
 0x2a2   :  { %708 = dma.vmem_to_hbm [thread:$0]  %s706_s14, 64, %s1231_s6, [#allocation5]  }
 0x2a3   :  { %1093 = dma.done.wait [#allocation5], 64  }
 0x2a4   :  { %1094 = vsyncadd [#allocation5], 4294967232 }
 0x2a5   :  { %712 = vsyncpa [#allocation4], 1 }
 0x2a6   :  { %713 = vsyncpa [#allocation7], 1 }
 0x2a7   :  { %714 = vsyncpa [#allocation5], 1 }

</bundles_post_ra>
